<compile_context>
chip_gen: v5e
topology: v5e:2x2
jax: 0.10.0
libtpu: 0.0.40
codegen_flags: <defaults>
</compile_context>

<pallas_src>
import jax
import jax.numpy as jnp
from jax.experimental import pallas as pl
from jax.experimental.pallas import tpu as pltpu


def _round_up(n, m):
    return ((n + m - 1) // m) * m


def autoencoder_kernel(x_ref, w_enc_ref, b_enc_ref, w_dec_ref, b_dec_ref, out_ref):
    # Cast the x tile to the weights' compute dtype (bf16) in-kernel: cheap VPU op with huge
    # slack, and it keeps the HBM-side x traffic at 4 B/elem with no extra round trip.
    x = x_ref[...].astype(w_enc_ref.dtype)

    # encoded = sigmoid(x @ W_enc + b_enc)   -- bf16 MXU inputs, f32 accumulation/activations
    enc = jnp.dot(x, w_enc_ref[...], preferred_element_type=jnp.float32)
    enc = jax.nn.sigmoid(enc + b_enc_ref[...])            # (tb, H) f32, exact sigmoid
    enc = enc.astype(w_dec_ref.dtype)                      # bf16 for the decoder matmul

    # decoded = sigmoid(encoded @ W_dec + b_dec)
    dec = jnp.dot(enc, w_dec_ref[...], preferred_element_type=jnp.float32)
    dec = jax.nn.sigmoid(dec + b_dec_ref[...])
    out_ref[...] = dec.astype(out_ref.dtype)


def _choose_tb(B, D, x_itemsize, out_itemsize, requested=None):
    """Pick the batch tile: big enough to amortize per-step pipeline overhead, small enough to
    (a) give >= 4 grid steps (>= 2 per v7x TensorCore) and (b) fit double-buffered x/out tiles
    in a ~16 MiB VMEM budget."""
    row_align = 16  # safe for bf16 sublane packing on the output tile
    if B <= row_align:
        return B
    if requested is None:
        tb = min(2048, _round_up(pl.cdiv(B, 4), row_align))
    else:
        tb = requested
    bytes_per_row = 2 * D * (x_itemsize + out_itemsize)    # double-buffered x + out rows
    vmem_cap = max(row_align, ((16 << 20) // bytes_per_row) // row_align * row_align)
    tb = min(tb, vmem_cap, _round_up(B, row_align))
    return max(row_align, _round_up(tb, row_align))


def prepare_params(w_enc, b_enc, w_dec, b_dec, compute_dtype=jnp.bfloat16):
    """One-time param prep (do this OUTSIDE the per-call forward): bf16 weights for the MXU,
    f32 biases reshaped to (1, N) for broadcasting in the kernel."""
    D, H = w_enc.shape
    return (w_enc.astype(compute_dtype),
            b_enc.astype(jnp.float32).reshape(1, H),
            w_dec.astype(compute_dtype),
            b_dec.astype(jnp.float32).reshape(1, D))


def autoencoder_forward(x, params, *, tb=None, out_dtype=jnp.bfloat16):
    """x: (B, D) (any float dtype, cast to bf16 in-kernel).
    params: (w_enc (D,H) bf16, b_enc (1,H) f32, w_dec (H,D) bf16, b_dec (1,D) f32)."""
    w_enc, b_enc2, w_dec, b_dec2 = params
    B, D = x.shape
    H = w_enc.shape[1]

    tb = _choose_tb(B, D, jnp.dtype(x.dtype).itemsize, jnp.dtype(out_dtype).itemsize, tb)
    grid = (pl.cdiv(B, tb),)

    return pl.pallas_call(
        autoencoder_kernel,
        out_shape=jax.ShapeDtypeStruct((B, D), out_dtype),
        grid_spec=pltpu.PrefetchScalarGridSpec(
            num_scalar_prefetch=0,
            grid=grid,
            in_specs=[
                pl.BlockSpec((tb, D), lambda i: (i, 0)),   # x batch tile (pipelined, raw dtype)
                pl.BlockSpec((D, H), lambda i: (0, 0)),    # encoder weight (VMEM-resident)
                pl.BlockSpec((1, H), lambda i: (0, 0)),    # encoder bias (f32)
                pl.BlockSpec((H, D), lambda i: (0, 0)),    # decoder weight (VMEM-resident)
                pl.BlockSpec((1, D), lambda i: (0, 0)),    # decoder bias (f32)
            ],
            out_specs=pl.BlockSpec((tb, D), lambda i: (i, 0)),
        ),
        compiler_params=pltpu.CompilerParams(
            dimension_semantics=("parallel",),   # batch tiles shard across TCs on v7x
        ),
    )(x, w_enc, b_enc2, w_dec, b_dec2)


def init_params(key, input_size, hidden_size):
    """Deterministic init matching the PyTorch module's __init__ (up to RNG stream)."""
    k_enc, k_dec = jax.random.split(key)
    # nn.init.normal_(encoder.weight, std=1/sqrt(input_size)); bias = 0.
    # PyTorch weight is (hidden, input); we store transposed (input, hidden).
    w_enc = (jax.random.normal(k_enc, (input_size, hidden_size), jnp.float32)
             / jnp.sqrt(jnp.float32(input_size)))
    b_enc = jnp.zeros((hidden_size,), jnp.float32)
    # nn.init.xavier_uniform_(decoder.weight, gain=4.0); bias = 0.
    # decoder.weight is (input_size, hidden_size): fan_in=hidden, fan_out=input.
    bound = 4.0 * (6.0 / (hidden_size + input_size)) ** 0.5
    w_dec_pt = jax.random.uniform(k_dec, (input_size, hidden_size), jnp.float32,
                                  minval=-bound, maxval=bound)
    w_dec = w_dec_pt.T  # stored as (hidden, input) for x_enc @ W_dec
    b_dec = jnp.zeros((input_size,), jnp.float32)
    return w_enc, b_enc, w_dec, b_dec


if __name__ == "__main__":
    # Small shapes consistent with the module's forward: x is (batch, input_size).
    input_size = 128
    hidden_size = 32
    batch = 64

    key = jax.random.PRNGKey(0)
    k_x, k_p = jax.random.split(key)
    w_enc, b_enc, w_dec, b_dec = init_params(k_p, input_size, hidden_size)
    params = prepare_params(w_enc, b_enc, w_dec, b_dec)   # one-time bf16/f32 prep

    x = jax.random.normal(k_x, (batch, input_size), jnp.float32)
    out = jax.block_until_ready(autoencoder_forward(x, params))

    # Pure-f32 reference; tolerance sized for bf16 matmul inputs + bf16 output quantization.
    ref = jax.nn.sigmoid(jax.nn.sigmoid(x @ w_enc + b_enc) @ w_dec + b_dec)
    assert out.shape == (batch, input_size)
    assert out.dtype == jnp.bfloat16
    out_f32 = out.astype(jnp.float32)
    assert bool(jnp.all(jnp.isfinite(out_f32)))
    assert bool(jnp.allclose(out_f32, ref, atol=3e-2, rtol=0.0)), "mismatch vs f32 reference"

    print("KERNEL_OK")
</pallas_src>

<mosaic_0001>
module attributes {stable_mosaic.version = 11 : i64} {
  func.func @autoencoder_kernel(%arg0: i32, %arg1: memref<16x128xf32, #tpu.memory_space<vmem>>, %arg2: memref<128x32xbf16, #tpu.memory_space<vmem>>, %arg3: memref<1x32xf32, #tpu.memory_space<vmem>>, %arg4: memref<32x128xbf16, #tpu.memory_space<vmem>>, %arg5: memref<1x128xf32, #tpu.memory_space<vmem>>, %arg6: memref<16x128xbf16, #tpu.memory_space<vmem>>) attributes {dimension_semantics = [#tpu.dimension_semantics<parallel>], iteration_bounds = array<i64: 4>, scalar_prefetch = 0 : i64, scratch_operands = 0 : i64, tpu.core_type = #tpu.core_type<tc>, window_params = [{transform_indices = @transform_0, window_bounds = array<i64: 16, 128>}, {pipeline_mode = #tpu.pipeline_mode<synchronous>, transform_indices = @transform_1, window_bounds = array<i64: 128, 32>}, {pipeline_mode = #tpu.pipeline_mode<synchronous>, transform_indices = @transform_2, window_bounds = array<i64: 1, 32>}, {pipeline_mode = #tpu.pipeline_mode<synchronous>, transform_indices = @transform_3, window_bounds = array<i64: 32, 128>}, {pipeline_mode = #tpu.pipeline_mode<synchronous>, transform_indices = @transform_4, window_bounds = array<i64: 1, 128>}, {transform_indices = @transform_5, window_bounds = array<i64: 16, 128>}]} {
    %c0 = arith.constant 0 : index
    %c0_0 = arith.constant 0 : index
    %0 = vector.load %arg1[%c0, %c0_0] : memref<16x128xf32, #tpu.memory_space<vmem>>, vector<16x128xf32>
    %1 = arith.truncf %0 : vector<16x128xf32> to vector<16x128xbf16>
    %c0_1 = arith.constant 0 : index
    %c0_2 = arith.constant 0 : index
    %2 = vector.load %arg2[%c0_1, %c0_2] : memref<128x32xbf16, #tpu.memory_space<vmem>>, vector<128x32xbf16>
    %cst = arith.constant dense<0.000000e+00> : vector<16x32xf32>
    %3 = tpu.matmul %1, %2, %cst {dimension_numbers = #tpu.dot_dimension_numbers<[1], [0], [0], [1], [0, 0, 1, 1], [], []>} : vector<16x128xbf16>, vector<128x32xbf16>, vector<16x32xf32> -> vector<16x32xf32>
    %c0_3 = arith.constant 0 : index
    %c0_4 = arith.constant 0 : index
    %4 = vector.load %arg3[%c0_3, %c0_4] : memref<1x32xf32, #tpu.memory_space<vmem>>, vector<1x32xf32>
    %5 = vector.broadcast %4 : vector<1x32xf32> to vector<16x32xf32>
    %6 = arith.addf %3, %5 : vector<16x32xf32>
    %7 = arith.negf %6 : vector<16x32xf32>
    %8 = math.exp %7 : vector<16x32xf32>
    %cst_5 = arith.constant 1.000000e+00 : f32
    %9 = vector.broadcast %cst_5 : f32 to vector<16x32xf32>
    %10 = arith.addf %9, %8 : vector<16x32xf32>
    %11 = arith.divf %9, %10 : vector<16x32xf32>
    %12 = arith.truncf %11 : vector<16x32xf32> to vector<16x32xbf16>
    %c0_6 = arith.constant 0 : index
    %c0_7 = arith.constant 0 : index
    %13 = vector.load %arg4[%c0_6, %c0_7] : memref<32x128xbf16, #tpu.memory_space<vmem>>, vector<32x128xbf16>
    %cst_8 = arith.constant dense<0.000000e+00> : vector<16x128xf32>
    %14 = tpu.matmul %12, %13, %cst_8 {dimension_numbers = #tpu.dot_dimension_numbers<[1], [0], [0], [1], [0, 0, 1, 1], [], []>} : vector<16x32xbf16>, vector<32x128xbf16>, vector<16x128xf32> -> vector<16x128xf32>
    %c0_9 = arith.constant 0 : index
    %c0_10 = arith.constant 0 : index
    %15 = vector.load %arg5[%c0_9, %c0_10] : memref<1x128xf32, #tpu.memory_space<vmem>>, vector<1x128xf32>
    %16 = vector.broadcast %15 : vector<1x128xf32> to vector<16x128xf32>
    %17 = arith.addf %14, %16 : vector<16x128xf32>
    %18 = arith.negf %17 : vector<16x128xf32>
    %19 = math.exp %18 : vector<16x128xf32>
    %cst_11 = arith.constant 1.000000e+00 : f32
    %20 = vector.broadcast %cst_11 : f32 to vector<16x128xf32>
    %21 = arith.addf %20, %19 : vector<16x128xf32>
    %22 = arith.divf %20, %21 : vector<16x128xf32>
    %23 = arith.truncf %22 : vector<16x128xf32> to vector<16x128xbf16>
    %c0_12 = arith.constant 0 : index
    %c0_13 = arith.constant 0 : index
    %24 = vector.load %arg6[%c0_12, %c0_13] : memref<16x128xbf16, #tpu.memory_space<vmem>>, vector<16x128xbf16>
    tpu.vector_store %arg6[%c0_12, %c0_13], %23 {strides = array<i32>} : memref<16x128xbf16, #tpu.memory_space<vmem>>, vector<16x128xbf16>,
    return
  }
  func.func @transform_0(%arg0: i32) -> (i32, i32) {
    %c0_i32 = arith.constant 0 : i32
    %c0_i32_0 = arith.constant 0 : i32
    return %arg0, %c0_i32 : i32, i32
  }
  func.func @transform_1(%arg0: i32) -> (i32, i32) {
    %c0_i32 = arith.constant 0 : i32
    %c0_i32_0 = arith.constant 0 : i32
    %c0_i32_1 = arith.constant 0 : i32
    return %c0_i32, %c0_i32_0 : i32, i32
  }
  func.func @transform_2(%arg0: i32) -> (i32, i32) {
    %c0_i32 = arith.constant 0 : i32
    %c0_i32_0 = arith.constant 0 : i32
    %c0_i32_1 = arith.constant 0 : i32
    return %c0_i32, %c0_i32_0 : i32, i32
  }
  func.func @transform_3(%arg0: i32) -> (i32, i32) {
    %c0_i32 = arith.constant 0 : i32
    %c0_i32_0 = arith.constant 0 : i32
    %c0_i32_1 = arith.constant 0 : i32
    return %c0_i32, %c0_i32_0 : i32, i32
  }
  func.func @transform_4(%arg0: i32) -> (i32, i32) {
    %c0_i32 = arith.constant 0 : i32
    %c0_i32_0 = arith.constant 0 : i32
    %c0_i32_1 = arith.constant 0 : i32
    return %c0_i32, %c0_i32_0 : i32, i32
  }
  func.func @transform_5(%arg0: i32) -> (i32, i32) {
    %c0_i32 = arith.constant 0 : i32
    %c0_i32_0 = arith.constant 0 : i32
    return %arg0, %c0_i32 : i32, i32
  }
}

</mosaic_0001>

<bundles_post_ra>
// kernel: tpu_custom_call.1
= control target key start
LH: loop header
LB: loop body
LE: loop exit
PB: predicated region body
PF: predicated region fallthrough
CT: control target
= control target key end

     0   :  { %10 = vsyncpa [#allocation3], 0  ;;  %s867_s0 = inlined_call_operand.vmem [shape: f32[64,128], index: 0, kind: input, shape index: {}]   ;;  %s868_s1 = inlined_call_operand.vmem [shape: bf16[128,32], index: 1, kind: input, shape index: {}]   ;;  %s869_s2 = inlined_call_operand.vmem [shape: f32[1,32], index: 2, kind: input, shape index: {}]   ;;  %s870_s3 = inlined_call_operand.vmem [shape: bf16[32,128], index: 3, kind: input, shape index: {}]   ;;  %s871_s4 = inlined_call_operand.vmem [shape: f32[1,128], index: 4, kind: input, shape index: {}]   ;;  %s872_s5 = inlined_call_operand.hbm [shape: bf16[64,128], index: 5, kind: output, shape index: {}]  }
   0x1   :  { %12 = vsyncpa [#allocation3 + $0x1], 0  ;;  %s737_s18 = smov 0   ;;  %s739_s19 = smov 0  }
   0x2   :  { %s741_s20 = smov 0   ;;  %s743_s21 = smov 0  }
   0x3 LB: > { %s758_s22 = sadd.s32 4294967295, %s703_s21   ;;  %s509_s23 = sadd.s32 4294967294, %s703_s21   ;;  %s703_s21 = sphi %s743_s21, %s878_s21   ;;  %s699_s20 = sphi %s741_s20, %s877_s20   ;;  %s695_s19 = sphi %s739_s19, %s876_s19   ;;  %s691_s18 = sphi %s737_s18, %s875_s18  }
   0x4   : > { %s762_s24 = sadd.s32 1, %s703_s21   ;;  %s135_s25 = sadd.s32 1, %s699_s20 }
   0x5   : > { %s132_s26 = ssub.s32 %s703_s21, %s762_s24  ;;  %p145_p0 = scmp.ne.s32.totalorder %s699_s20, %s695_s19 }
   0x6   : > { %p133_p1 = scmp.eq.s32.totalorder %s132_s26, 0  ;;  %p146_p2 = scmp.eq.s32.totalorder %s758_s22, 3 }
   0x7   : > { %p151_p3 = scmp.ne.s32.totalorder %s695_s19, %s691_s18  ;;  %p152_p4 = scmp.eq.s32.totalorder %s509_s23, 3 }
   0x8   : > { %s773_s27 = scalar_select %p133_p1, %s699_s20, %s135_s25  }
   0x9   : > { %p775_p5 = por %p146_p2, %p145_p0  ;;  %p779_p6 = por %p152_p4, %p151_p3 }
   0xa   : > { %p512_p7 = scmp.ge.s32.totalorder %s703_s21, 1  ;;  %p191_p8 = scmp.lt.s32.totalorder %s703_s21, 5 }
   0xc   : > { %p192_p9 = pnand %p512_p7, %p191_p8 }
   0xd   : > { %s514_s11 = sshll.u32 (!%p192_p9), %s758_s22, 1  ;;  %s576_s26 = sshll.u32 (!%p192_p9), %s758_s22, 3 }
   0xe   : > { %195 = sbr.rel (%p192_p9) target bundleno = 387 (0x183), region = 40  ;;  %p220_p10 = scmp.lt.s32.totalorder (!%p192_p9), %s514_s11, 7 }
   0xf   : > { %s661_s15 = scalar_lea.hbm (!%p192_p9), %s872_s5, 32 }
  0x13   : > { %v573_v0 = vld [vmem:[%s868_s1 + $0x38] sm:$0xff]  ;;  %v572_v1 = vld [vmem:[%s868_s1 + $0x30] sm:$0xff]  ;;  %v571_v2 = vld [vmem:[%s868_s1 + $0x28] sm:$0xff]  ;;  %s880_s11 = smov (!%p220_p10, %s514_s11), 7  ;;  %vm371_vm8 = vcmask 261120  }
  0x14   : > { %298 = vmatpush.bf16.msra.mxu0 %v573_v0  ;;  %v570_v3 = vld [vmem:[%s868_s1 + $0x20] sm:$0xff]  ;;  %v569_v4 = vld [vmem:[%s868_s1 + $0x18] sm:$0xff]  ;;  %v568_v5 = vld [vmem:[%s868_s1 + $0x10] sm:$0xff]  ;;  %s515_s23 = sshll.u32 %s880_s11, 3 }
  0x15   : > { %v567_v6 = vld [vmem:[%s868_s1 + $0x8] sm:$0xff]  ;;  %s223_s7 = scalar_lea.vmem %s867_s0, %s515_s23  ;;  %v566_v7 = vld [vmem:[%s868_s1] sm:$0xff]  ;;  %s216_s23 = sand.u32 1, %s695_s19  }
  0x16   : > { %v227_v8 = vld [vmem:[%s223_s7] sm:$0xff]  ;;  %v228_v9 = vld [vmem:[%s223_s7 + $0x8] sm:$0xff]  ;;  %s828_s25 = sshll.u32 %s216_s23, 3  ;;  %s443_s7 = scalar_lea.hbm %s872_s5, %s576_s26 }
  0x17   : > { %v229_v10 = vpack.c.bf16 %v228_v9, %v227_v8  ;;  %v623_v11 = vld [vmem:[%s869_s2] ss:$0 sm:$0xff]  ;;  %v575_v12 = vld [vmem:[%s870_s3 + $0x8] sm:$0xff]  ;;  %s218_s22 = scalar_lea.vmem [#allocation2], %s828_s25  ;;  %s446_s9 = sshll.u32 %s443_s7, 4  ;;  %s447_s9 = int_to_ptr.hbm [resolvable:$true] %s446_s9 }
  0x18   : > { %299 = vmatpush.bf16.msra.mxu0 %v572_v1  ;;  %381 = vmatpush.bf16.msra.mxu1 %v575_v12  ;;  %v574_v13 = vld [vmem:[%s870_s3] sm:$0xff]  ;;  %s835_s8 = sshll.u32 %s218_s22, 4  ;;  %s432_s10 = scalar_lea.sflag [#allocation3], %s216_s23  ;;  %s445_s8 = int_to_ptr.vmem [resolvable:$true] %s835_s8 }
  0x19   : > { %v624_v45 = vld [vmem:[%s871_s4] ss:$0 sm:$0xff]  ;;  %s655_s11 = sshra.s32 %s447_s9, 4  ;;  %s656_s11 = int_to_ptr.hbm [resolvable:$true] %s655_s11 }
  0x1a   : > { %s657_s12 = scalar_lea.hbm %s656_s11, 8  ;;  %p662_p0 = scmp.lt.s32.totalorder %s656_s11, %s872_s5 }
  0x1b   : > { %p658_p11 = scmp.ne.s32.totalorder %s656_s11, %s657_s12  ;;  %p663_p1 = scmp.lt.s32.totalorder %s661_s15, %s657_s12 }
  0x1c   : > { %300 = vmatpush.bf16.msra.mxu0 %v571_v2  ;;  %382 = vmatpush.bf16.msra.mxu1 %v574_v13 }
  0x1d   : > { %p659_p12 = pnand %p658_p11, %p775_p5  ;;  %p664_p2 = por %p663_p1, %p662_p0 }
  0x1f   : > { %p660_p13 = pneg %p659_p12 }
  0x20   : > { %301 = vmatpush.bf16.msra.mxu0 %v570_v3 }
  0x21   : > { %p665_p3 = pnand %p664_p2, %p660_p13 }
  0x24   : > { %302 = vmatpush.bf16.msra.mxu0 %v569_v4 }
  0x28   : > { %303 = vmatpush.bf16.msra.mxu0 %v568_v5 }
  0x2c   : > { %304 = vmatpush.bf16.msra.mxu0 %v567_v6 }
  0x30   : > { %305 = vmatpush.bf16.msra.mxu0 %v566_v7 }
  0x33   : > { %306 = vmatmul.bf16.vlgmr.msra.gmra.mxu0 %v229_v10 }
  0xb0   : > { %v307_v14 = vpop.f32.mrf.mxu0 }
  0xb1   : > { %v308_v15 = vadd.f32 %v623_v11, %v307_v14 }
  0xb3   : > { %v548_v16 = vmul.f32 -1.442695, %v308_v15 }
  0xb5   : > { %625 = vpow2.f32 %v548_v16 }
  0xb8   : > { %v309_v17 = vpop.f32.mrf.mxu0 }
  0xb9   : > { %v310_v18 = vadd.f32 %v623_v11, %v309_v17 }
  0xbb   : > { %v626_v19 = vpop.eup %625  ;;  %v549_v20 = vmul.f32 -1.442695, %v310_v18 }
  0xbc   : > { %v318_v21 = vadd.f32 1.0, %v626_v19 }
  0xbd   : > { %627 = vpow2.f32 %v549_v20 }
  0xbe   : > { %629 = vrcp.f32 %v318_v21  ;;  %vm325_vm1 = vweird.f32 %v318_v21  ;;  %v331_v32 = vand.u32 2147483648, %v318_v21  ;;  %v329_v34 = vand.u32 2147483647, %v318_v21 }
  0xc0   : > { %v332_v39 = vor.u32 1.1754944e-38, %v331_v32  ;;  %vm330_vm6 = vcmp.eq.f32.partialorder %v329_v34, 8.507059e+37 }
  0xc3   : > { %v628_v22 = vpop.eup %627 }
  0xc4   : > { %v630_v23 = vpop.eup %629  ;;  %v319_v24 = vadd.f32 1.0, %v628_v22 }
  0xc5   : > { %v321_v25 = vmul.f32 %v630_v23, %v318_v21  ;;  %vm326_vm0 = vweird.f32 %v630_v23 }
  0xc6   : > { %631 = vrcp.f32 %v319_v24  ;;  %v346_v33 = vand.u32 2147483648, %v319_v24  ;;  %v344_v36 = vand.u32 2147483647, %v319_v24  ;;  %vm327_vm3 = vmor %vm325_vm1, %vm326_vm0  ;;  %vm340_vm4 = vweird.f32 %v319_v24 }
  0xc7   : > { %v322_v26 = vsub.f32 1.0, %v321_v25 }
  0xc8   : > { %v347_v40 = vor.u32 1.1754944e-38, %v346_v33  ;;  %vm345_vm7 = vcmp.eq.f32.partialorder %v344_v36, 8.507059e+37 }
  0xc9   : > { %v323_v27 = vmul.f32 %v630_v23, %v322_v26 }
  0xcb   : > { %v324_v30 = vadd.f32 %v630_v23, %v323_v27 }
  0xcc   : > { %v632_v28 = vpop.eup %631 }
  0xcd   : > { %v336_v29 = vmul.f32 %v632_v28, %v319_v24  ;;  %vm341_vm2 = vweird.f32 %v632_v28  ;;  %v328_v37 = vsel %vm327_vm3, %v630_v23, %v324_v30 }
  0xce   : > { %vm342_vm5 = vmor %vm340_vm4, %vm341_vm2  ;;  %v333_v42 = vsel %vm330_vm6, %v332_v39, %v328_v37 }
  0xcf   : > { %v337_v31 = vsub.f32 1.0, %v336_v29 }
  0xd1   : > { %v338_v35 = vmul.f32 %v632_v28, %v337_v31 }
  0xd3   : > { %v339_v38 = vadd.f32 %v632_v28, %v338_v35 }
  0xd5   : > { %v343_v41 = vsel %vm342_vm5, %v632_v28, %v339_v38 }
  0xd6   : > { %v348_v43 = vsel %vm345_vm7, %v347_v40, %v343_v41 }
  0xd7   : > { %v350_v44 = vpack.c.bf16 %v348_v43, %v333_v42 }
  0xd9   : > { %558 = vmatmul.msk.bf16.vlgmr.msra.gmra.mxu1 %vm371_vm8, %v350_v44 }
 0x156   : > { %v384_v46 = vpop.f32.mrf.mxu1 }
 0x157   : > { %v385_v47 = vadd.f32 %v624_v45, %v384_v46 }
 0x159   : > { %v559_v48 = vmul.f32 -1.442695, %v385_v47 }
 0x15b   : > { %633 = vpow2.f32 %v559_v48 }
 0x15e   : > { %v386_v49 = vpop.f32.mrf.mxu1 }
 0x15f   : > { %v387_v50 = vadd.f32 %v624_v45, %v386_v49 }
 0x161   : > { %v634_v51 = vpop.eup %633  ;;  %v560_v52 = vmul.f32 -1.442695, %v387_v50 }
 0x162   : > { %v395_v53 = vadd.f32 1.0, %v634_v51 }
 0x163   : > { %635 = vpow2.f32 %v560_v52 }
 0x164   : > { %637 = vrcp.f32 %v395_v53  ;;  %vm402_vm10 = vweird.f32 %v395_v53  ;;  %v408_v0 = vand.u32 2147483648, %v395_v53  ;;  %v406_v3 = vand.u32 2147483647, %v395_v53 }
 0x166   : > { %v409_v7 = vor.u32 1.1754944e-38, %v408_v0  ;;  %vm407_vm15 = vcmp.eq.f32.partialorder %v406_v3, 8.507059e+37 }
 0x169   : > { %v636_v54 = vpop.eup %635 }
 0x16a   : > { %v638_v55 = vpop.eup %637  ;;  %v396_v56 = vadd.f32 1.0, %v636_v54 }
 0x16b   : > { %v398_v57 = vmul.f32 %v638_v55, %v395_v53  ;;  %vm403_vm9 = vweird.f32 %v638_v55 }
 0x16c   : > { %639 = vrcp.f32 %v396_v56  ;;  %v423_v1 = vand.u32 2147483648, %v396_v56  ;;  %v421_v4 = vand.u32 2147483647, %v396_v56  ;;  %vm404_vm12 = vmor %vm402_vm10, %vm403_vm9  ;;  %vm417_vm13 = vweird.f32 %v396_v56 }
 0x16d   : > { %v399_v58 = vsub.f32 1.0, %v398_v57 }
 0x16e   : > { %v424_v8 = vor.u32 1.1754944e-38, %v423_v1  ;;  %vm422_vm0 = vcmp.eq.f32.partialorder %v421_v4, 8.507059e+37 }
 0x16f   : > { %v400_v59 = vmul.f32 %v638_v55, %v399_v58 }
 0x171   : > { %v401_v63 = vadd.f32 %v638_v55, %v400_v59 }
 0x172   : > { %v640_v60 = vpop.eup %639 }
 0x173   : > { %v413_v61 = vmul.f32 %v640_v60, %v396_v56  ;;  %vm418_vm11 = vweird.f32 %v640_v60  ;;  %v405_v5 = vsel %vm404_vm12, %v638_v55, %v401_v63 }
 0x174   : > { %vm419_vm14 = vmor %vm417_vm13, %vm418_vm11  ;;  %v410_v10 = vsel %vm407_vm15, %v409_v7, %v405_v5 }
 0x175   : > { %v414_v62 = vsub.f32 1.0, %v413_v61 }
 0x177   : > { %v415_v2 = vmul.f32 %v640_v60, %v414_v62 }
 0x179   : > { %v416_v6 = vadd.f32 %v640_v60, %v415_v2 }
 0x17b   : > { %v420_v9 = vsel %vm419_vm14, %v640_v60, %v416_v6 }
 0x17c   : > { %v425_v11 = vsel %vm422_vm0, %v424_v8, %v420_v9 }
 0x17d   : > { %v580_v12 = vpack.c.bf16 %v425_v11, %v410_v10 }
 0x17f   : > { %581 = vst [vmem:[%s218_s22] sm:$0xff] %v580_v12  }
 0x180   : > { %668 = shalt.err (!%p665_p3)
}
 0x181   : > { %s705_s23 = smov 64   ;;  %s706_s25 = smov 4  }
 0x182   : > { %582 = dma.vmem_to_hbm [thread:$0]  (%p775_p5), %s445_s8, 128, %s447_s9, %s432_s10, %s705_s23, %s705_s23, %s706_s25  }
 0x183 PF: > { %p588_p4 = scmp.ge.s32.totalorder %s703_s21, 2  ;;  %s461_s26 = sand.u32 1, %s691_s18  }
 0x184   : > { %s462_s30 = scalar_lea.sflag [#allocation3], %s461_s26 }
 0x185   : > { %p585_p7 = pnand %p588_p4, %p779_p6 }
 0x187   : > { %p586_p8 = pneg %p585_p7 }
 0x189   : > { %686 = dma.done.wait (%p586_p8), %s462_s30, 128  }
 0x18a   : > { %688 = vsyncadd (%p586_p8), %s462_s30, 4294967168  ;;  %p15_p9 = scmp.ge.s32.totalorder %s762_s24, 6   ;;  %s875_s18 = smov %s695_s19 }
 0x18b   : > { %s876_s19 = smov %s699_s20  ;;  %s877_s20 = smov %s773_s27 }
 0x18c   : > { %s878_s21 = smov %s762_s24  ;;  %17 = sbr.rel (!%p15_p9) target bundleno = 3 (0x3), region = 75 }
 0x191   :  { %468 = vsyncpa [#allocation3], 1 }
 0x192   :  { %470 = vsyncpa [#allocation3 + $0x1], 1 }

</bundles_post_ra>
